<compile_context>
chip_gen: v7x
topology: tpu7x:2x2x1
jax: 0.10.0
libtpu: 0.0.40
codegen_flags: <defaults>
</compile_context>

<pallas_src>
import functools
from math import sqrt

import jax
import jax.numpy as jnp
from jax.experimental import pallas as pl
from jax.experimental.pallas import tpu as pltpu


def _round_up(n, m):
    return ((n + m - 1) // m) * m


def _mlp_kernel(params_ref, x_ref, o_ref, *, state_num, hidden, action_num):
    """One batch tile: (TB, S) -> (TB, A). Params come from one packed slab."""
    S, H, A = state_num, hidden, action_num

    # Static row offsets into the packed (rows_padded, 128) parameter slab.
    r = 0
    w1 = params_ref[r:r + S, 0:H]; r += S          # (S, H)
    b1 = params_ref[r:r + 1, 0:H]; r += 1          # (1, H)
    w2 = params_ref[r:r + H, 0:H]; r += H          # (H, H)
    b2 = params_ref[r:r + 1, 0:H]; r += 1          # (1, H)
    w3 = params_ref[r:r + H, 0:A]; r += H          # (H, A)
    b3 = params_ref[r:r + 1, 0:A]; r += 1          # (1, A)

    x = x_ref[...]                                                    # (TB, S)
    h1 = jnp.maximum(
        jnp.dot(x, w1, preferred_element_type=jnp.float32) + b1, 0.0)  # (TB, H)
    h2 = jnp.maximum(
        jnp.dot(h1, w2, preferred_element_type=jnp.float32) + b2, 0.0)  # (TB, H)
    out = jnp.dot(h2, w3, preferred_element_type=jnp.float32) + b3      # (TB, A)
    o_ref[...] = out.astype(o_ref.dtype)


def pack_params(params):
    """Concatenate (w1,b1,w2,b2,w3,b3) into one (rows_pad, 128) f32 slab."""
    w1, b1, w2, b2, w3, b3 = (params["w1"], params["b1"], params["w2"],
                              params["b2"], params["w3"], params["b3"])
    S, H = w1.shape
    A = w3.shape[1]
    rows = S + 1 + H + 1 + H + 1
    rows_pad = _round_up(rows, 8)
    W = 128                                       # lane-dense slab width
    slab = jnp.zeros((rows_pad, W), jnp.float32)
    r = 0
    slab = slab.at[r:r + S, :H].set(w1); r += S
    slab = slab.at[r:r + 1, :H].set(b1.reshape(1, H)); r += 1
    slab = slab.at[r:r + H, :H].set(w2); r += H
    slab = slab.at[r:r + 1, :H].set(b2.reshape(1, H)); r += 1
    slab = slab.at[r:r + H, :A].set(w3); r += H
    slab = slab.at[r:r + 1, :A].set(b3.reshape(1, A)); r += 1
    return slab


@functools.partial(jax.jit, static_argnames=("hidden", "action_num", "block_b"))
def net_forward_packed(x, packed, *, hidden, action_num, block_b=512):
    """x: (B, state_num) f32; packed: slab from pack_params. Returns (B, A)."""
    B, S = x.shape
    H, A = hidden, action_num

    # Batch tile: multiple of 8 sublanes, capped so VMEM use stays tiny.
    TB = min(block_b, _round_up(B, 8))
    B_pad = _round_up(B, TB)
    if B_pad != B:
        x = jnp.pad(x, ((0, B_pad - B), (0, 0)))
    grid = B_pad // TB

    kernel = functools.partial(_mlp_kernel, state_num=S, hidden=H, action_num=A)

    out = pl.pallas_call(
        kernel,
        out_shape=jax.ShapeDtypeStruct((B_pad, A), jnp.float32),
        grid_spec=pltpu.PrefetchScalarGridSpec(
            num_scalar_prefetch=0,
            grid=(grid,),
            in_specs=[
                # Parameter slab: constant block index -> DMA'd once, resident.
                pl.BlockSpec(packed.shape, lambda i: (0, 0)),
                # Activations: one batch tile per grid step.
                pl.BlockSpec((TB, S), lambda i: (i, 0)),
            ],
            out_specs=pl.BlockSpec((TB, A), lambda i: (i, 0)),
        ),
        compiler_params=pltpu.CompilerParams(
            dimension_semantics=("parallel",)),
    )(packed, x)

    return out[:B]


def init_params(key, state_num, action_num, hidden_unit=16):
    """Mirror the PyTorch module's init:
       weights ~ U(0, 1/sqrt(fan_in))               (Net.__init__)
       biases  ~ U(-1/sqrt(fan_in), 1/sqrt(fan_in)) (nn.Linear default)
       Weights stored transposed: (in_features, out_features)."""
    ks = jax.random.split(key, 6)

    def w(k, fan_in, fan_out):
        return jax.random.uniform(k, (fan_in, fan_out), jnp.float32,
                                  minval=0.0, maxval=1.0 / sqrt(fan_in))

    def b(k, fan_in, fan_out):
        bound = 1.0 / sqrt(fan_in)
        return jax.random.uniform(k, (1, fan_out), jnp.float32,
                                  minval=-bound, maxval=bound)

    return {
        "w1": w(ks[0], state_num, hidden_unit),
        "b1": b(ks[1], state_num, hidden_unit),
        "w2": w(ks[2], hidden_unit, hidden_unit),
        "b2": b(ks[3], hidden_unit, hidden_unit),
        "w3": w(ks[4], hidden_unit, action_num),
        "b3": b(ks[5], hidden_unit, action_num),
    }


def _reference(x, params):
    h1 = jnp.maximum(x @ params["w1"] + params["b1"], 0.0)
    h2 = jnp.maximum(h1 @ params["w2"] + params["b2"], 0.0)
    return h2 @ params["w3"] + params["b3"]


if __name__ == "__main__":
    state_num, action_num, hidden_unit = 8, 2, 16

    key = jax.random.PRNGKey(0)
    k_x1, k_x2, k_p = jax.random.split(key, 3)
    params = init_params(k_p, state_num, action_num, hidden_unit)
    packed = pack_params(params)

    ok = True
    # B=2: the online-inference / action-selection path (odd batch, padded).
    # B=64: a DQN replay-batch style call exercising the batch-tiled grid.
    for kx, batch in ((k_x1, 2), (k_x2, 64)):
        x = jax.random.normal(kx, (batch, state_num), dtype=jnp.float32)
        q = net_forward_packed(x, packed, hidden=hidden_unit,
                               action_num=action_num)
        jax.block_until_ready(q)
        ref = _reference(x, params)
        ok = ok and bool(jnp.allclose(q, ref, atol=1e-5, rtol=1e-5))
        assert q.shape == (batch, action_num)

    assert ok
    print("KERNEL_OK")
</pallas_src>

<mosaic_0001>
module attributes {stable_mosaic.version = 11 : i64} {
  func.func @_mlp_kernel(%arg0: i32, %arg1: memref<48x128xf32, #tpu.memory_space<vmem>>, %arg2: memref<8x8xf32, #tpu.memory_space<vmem>>, %arg3: memref<8x2xf32, #tpu.memory_space<vmem>>) attributes {dimension_semantics = [#tpu.dimension_semantics<parallel>], iteration_bounds = array<i64: 1>, scalar_prefetch = 0 : i64, scratch_operands = 0 : i64, tpu.core_type = #tpu.core_type<tc>, window_params = [{pipeline_mode = #tpu.pipeline_mode<synchronous>, transform_indices = @transform_0, window_bounds = array<i64: 48, 128>}, {transform_indices = @transform_1, window_bounds = array<i64: 8, 8>}, {transform_indices = @transform_2, window_bounds = array<i64: 8, 2>}]} {
    %c0 = arith.constant 0 : index
    %c0_0 = arith.constant 0 : index
    %0 = vector.load %arg1[%c0, %c0_0] : memref<48x128xf32, #tpu.memory_space<vmem>>, vector<8x16xf32>
    %c8 = arith.constant 8 : index
    %c0_1 = arith.constant 0 : index
    %1 = vector.load %arg1[%c8, %c0_1] : memref<48x128xf32, #tpu.memory_space<vmem>>, vector<1x16xf32>
    %c9 = arith.constant 9 : index
    %c0_2 = arith.constant 0 : index
    %2 = vector.load %arg1[%c9, %c0_2] : memref<48x128xf32, #tpu.memory_space<vmem>>, vector<16x16xf32>
    %c25 = arith.constant 25 : index
    %c0_3 = arith.constant 0 : index
    %3 = vector.load %arg1[%c25, %c0_3] : memref<48x128xf32, #tpu.memory_space<vmem>>, vector<1x16xf32>
    %c26 = arith.constant 26 : index
    %c0_4 = arith.constant 0 : index
    %4 = vector.load %arg1[%c26, %c0_4] : memref<48x128xf32, #tpu.memory_space<vmem>>, vector<16x2xf32>
    %c42 = arith.constant 42 : index
    %c0_5 = arith.constant 0 : index
    %5 = vector.load %arg1[%c42, %c0_5] : memref<48x128xf32, #tpu.memory_space<vmem>>, vector<1x2xf32>
    %c0_6 = arith.constant 0 : index
    %c0_7 = arith.constant 0 : index
    %6 = vector.load %arg2[%c0_6, %c0_7] : memref<8x8xf32, #tpu.memory_space<vmem>>, vector<8x8xf32>
    %cst = arith.constant dense<0.000000e+00> : vector<8x16xf32>
    %7 = tpu.matmul %6, %0, %cst {dimension_numbers = #tpu.dot_dimension_numbers<[1], [0], [0], [1], [0, 0, 1, 1], [], []>} : vector<8x8xf32>, vector<8x16xf32>, vector<8x16xf32> -> vector<8x16xf32>
    %8 = vector.broadcast %1 : vector<1x16xf32> to vector<8x16xf32>
    %9 = arith.addf %7, %8 : vector<8x16xf32>
    %cst_8 = arith.constant 0.000000e+00 : f32
    %10 = vector.broadcast %cst_8 : f32 to vector<8x16xf32>
    %11 = arith.maximumf %9, %10 : vector<8x16xf32>
    %cst_9 = arith.constant dense<0.000000e+00> : vector<8x16xf32>
    %12 = tpu.matmul %11, %2, %cst_9 {dimension_numbers = #tpu.dot_dimension_numbers<[1], [0], [0], [1], [0, 0, 1, 1], [], []>} : vector<8x16xf32>, vector<16x16xf32>, vector<8x16xf32> -> vector<8x16xf32>
    %13 = vector.broadcast %3 : vector<1x16xf32> to vector<8x16xf32>
    %14 = arith.addf %12, %13 : vector<8x16xf32>
    %cst_10 = arith.constant 0.000000e+00 : f32
    %15 = vector.broadcast %cst_10 : f32 to vector<8x16xf32>
    %16 = arith.maximumf %14, %15 : vector<8x16xf32>
    %cst_11 = arith.constant dense<0.000000e+00> : vector<8x2xf32>
    %17 = tpu.matmul %16, %4, %cst_11 {dimension_numbers = #tpu.dot_dimension_numbers<[1], [0], [0], [1], [0, 0, 1, 1], [], []>} : vector<8x16xf32>, vector<16x2xf32>, vector<8x2xf32> -> vector<8x2xf32>
    %18 = vector.broadcast %5 : vector<1x2xf32> to vector<8x2xf32>
    %19 = arith.addf %17, %18 : vector<8x2xf32>
    %c0_12 = arith.constant 0 : index
    %c0_13 = arith.constant 0 : index
    %20 = vector.load %arg3[%c0_12, %c0_13] : memref<8x2xf32, #tpu.memory_space<vmem>>, vector<8x2xf32>
    tpu.vector_store %arg3[%c0_12, %c0_13], %19 {strides = array<i32>} : memref<8x2xf32, #tpu.memory_space<vmem>>, vector<8x2xf32>,
    return
  }
  func.func @transform_0(%arg0: i32) -> (i32, i32) {
    %c0_i32 = arith.constant 0 : i32
    %c0_i32_0 = arith.constant 0 : i32
    %c0_i32_1 = arith.constant 0 : i32
    return %c0_i32, %c0_i32_0 : i32, i32
  }
  func.func @transform_1(%arg0: i32) -> (i32, i32) {
    %c0_i32 = arith.constant 0 : i32
    %c0_i32_0 = arith.constant 0 : i32
    return %arg0, %c0_i32 : i32, i32
  }
  func.func @transform_2(%arg0: i32) -> (i32, i32) {
    %c0_i32 = arith.constant 0 : i32
    %c0_i32_0 = arith.constant 0 : i32
    return %arg0, %c0_i32 : i32, i32
  }
}

</mosaic_0001>

<bundles_post_ra>
// kernel: net_forward_packed.1
= control target key start
LH: loop header
LB: loop body
LE: loop exit
PB: predicated region body
PF: predicated region fallthrough
CT: control target
= control target key end

     0   :  { %7 = vsyncpa [#allocation3], 0  ;;  %s345_s9 = smov [#allocation2]   ;;  %s384_s0 = inlined_call_operand.hbm [shape: f32[48,128], index: 0, kind: input, shape index: {}]   ;;  %s385_s1 = inlined_call_operand.vmem [shape: f32[8,8], index: 1, kind: input, shape index: {}]   ;;  %s386_s2 = inlined_call_operand.vmem [shape: f32[8,2], index: 2, kind: output, shape index: {}]  }
   0x1   :  { %s13_s10 = sshll.u32 %s345_s9, 4  ;;  %s321_s13 = scalar_lea.hbm %s384_s0, 768  ;;  %s14_s10 = int_to_ptr.vmem [resolvable:$true] %s13_s10 }
   0x2   :  { %p322_p0 = scmp.ne.s32.totalorder %s384_s0, %s321_s13  ;;  %p325_p1 = scmp.lt.u32.totalorder %s321_s13, %s384_s0 }
   0x4   :  { %p327_p2 = pnand %p325_p1, %p322_p0 }
   0x6   :  { %330 = shalt.err (!%p327_p2)
}
   0x7   :  { %s331_s18 = scalar_lea.vmem %s14_s10, 768  ;;  %p336_p4 = scmp.lt.s32.totalorder %s14_s10, %s14_s10 }
   0x8   :  { %p332_p3 = scmp.ne.s32.totalorder %s14_s10, %s331_s18  ;;  %p337_p5 = scmp.lt.s32.totalorder %s331_s18, %s331_s18 }
   0xa   :  { %p338_p6 = por %p337_p5, %p336_p4 }
   0xc   :  { %p339_p7 = pnand %p338_p6, %p332_p3 }
   0xe   :  { %342 = shalt.err (!%p339_p7)
}
   0xf   :  { %s346_s19 = smov 128   ;;  %s347_s20 = smov 8  }
  0x10   :  { %19 = dma.hbm_to_vmem [thread:$0]  %s384_s0, 768, %s14_s10, [#allocation3], %s346_s19, %s346_s19, %s347_s20  }
  0x11   :  { %343 = dma.done.wait [#allocation3], 768  }
  0x12   :  { %344 = vsyncadd [#allocation3], 4294966528  ;;  %v348_v0 = vmov 0.0   ;;  %vm349_vm0 = vmmov 0   ;;  %vm38_vm1 = vcmask 64512   ;;  %v25_v1 = vld [vmem:[#allocation2] sm:$0xff] }
  0x13   :  { %290 = vmatprep.subr.mxu0 %v348_v0  ;;  %292 = vmatprep.mubr.msk.f32.mxu0 %vm349_vm0, %v348_v0  ;;  %v33_v2 = vld [vmem:[%s385_s1] sm:$0xff]  ;;  %v27_v3 = vld [vmem:[#allocation2 + $0x9] sm:$0xff]  ;;  %v28_v4 = vld [vmem:[#allocation2 + $0x11] sm:$0xff]  ;;  %v350_v6 = vmov 0.0|0.0   ;;  %vm117_vm2 = vcmask 130048   ;;  %vm269_vm3 = vcmask 15360  }
  0x14   :  { %299 = vmatprep.mubr.msk.f32.mxu1 %vm349_vm0, %v348_v0  ;;  %291 = vmatpush3.msra.mxu0 %v25_v1  ;;  %v310_v5 = vpack.c.bf16 %v28_v4, %v27_v3  ;;  %v276_v7 = vld [vmem:[#allocation2 + $0x8] ss:$0 sm:$0xff]  ;;  %v30_v12 = vld [vmem:[#allocation2 + $0x1a] sm:$0xff]  ;;  %v278_v15 = vld [vmem:[#allocation2 + $0x19] ss:$0 sm:$0xff] }
  0x15   :  { %293 = vmatmul.mubr.msk.f32.vlgmr.msra.gmra.mrb[0].mxu0 %vm38_vm1, %v33_v2  ;;  %309 = vmatprep.subr.bf16.mxu1 %v350_v6  ;;  %v31_v13 = vld [vmem:[#allocation2 + $0x22] sm:$0xff]  ;;  %v280_v20 = vld [vmem:[#allocation2 + $0x2a] ss:$0 sm:$0xff] }
  0x16   :  { %306 = vmatprep.mubr.msk.f32.mxu0 %vm349_vm0, %v348_v0  ;;  %312 = vmatprep.subr.bf16.mxu0 %v350_v6  ;;  %v313_v14 = vpack.c.bf16 %v31_v13, %v30_v12 }
  0x17   :  { %311 = vmatpush3.bf16.msra.mxu1 %v310_v5 }
  0x18   :  { %314 = vmatpush3.bf16.msra.mxu0 %v313_v14 }
  0xe8   :  { %v108_v8 = vpop.f32.mrb[0].mxu0 }
  0xe9   :  { %v109_v9 = vadd.f32 %v276_v7, %v108_v8  ;;  %v294_v10 = vpop.f32.mrb[1].mxu0 }
  0xeb   :  { %v112_v11 = vmax.f32 %v109_v9, 0.0 }
  0xed   :  { %300 = vmatmul.mubr.msk.f32.vlgmr.msra.gmra.mrb[0].mxu1 %vm117_vm2, %v112_v11 }
 0x1c0   :  { %v187_v16 = vpop.f32.mrb[0].mxu1 }
 0x1c1   :  { %v188_v17 = vadd.f32 %v278_v15, %v187_v16  ;;  %v301_v18 = vpop.f32.mrb[1].mxu1 }
 0x1c3   :  { %v191_v19 = vmax.f32 %v188_v17, 0.0 }
 0x1c5   :  { %307 = vmatmul.mubr.msk.f32.vlgmr.msra.gmra.mrb[2].mxu0 %vm117_vm2, %v191_v19 }
 0x298   :  { %v265_v21 = vpop.f32.mrb[2].mxu0 }
 0x299   :  { %v266_v22 = vadd.f32 %v280_v20, %v265_v21  ;;  %v308_v23 = vpop.f32.mrb[3].mxu0 }
 0x29b   :  { %270 = vst.msk [vmem:[%s386_s2] sm:$0xff] %vm269_vm3, %v266_v22 }
 0x29c   :  { %275 = vsyncpa [#allocation3], 1 }

</bundles_post_ra>
